<compile_context>
chip_gen: v7x
topology: tpu7x:2x2x1
jax: 0.10.0
libtpu: 0.0.40
codegen_flags: <defaults>
</compile_context>

<pallas_src>
import functools

import jax
import jax.numpy as jnp
from jax.experimental import pallas as pl
from jax.experimental.pallas import tpu as pltpu


def _net_kernel(x_ref, w1_ref, w23_ref, out_ref, *, a1_s):
    # x_ref:   [tb, S]
    # w1_ref:  [S, H]        (fc1_w pre-transposed)
    # w23_ref: [H, a1_s+a2_s] (fc2_w ++ fc3_w, pre-transposed)
    # out_ref: [tb, a1_s+a2_s]
    x = x_ref[...]
    # hidden = relu(x @ W1^T)
    h = jnp.maximum(
        jnp.dot(x, w1_ref[...], preferred_element_type=jnp.float32), 0.0)
    # both heads in one MXU pass, relu before softmax (as in the module)
    z = jnp.maximum(
        jnp.dot(h, w23_ref[...], preferred_element_type=jnp.float32), 0.0)

    def _softmax(zz):
        m = jnp.max(zz, axis=-1, keepdims=True)
        e = jnp.exp(zz - m)
        denom = jnp.sum(e, axis=-1, keepdims=True)
        return e * pl.reciprocal(denom, approx=True)

    out_ref[...] = jnp.concatenate(
        [_softmax(z[:, :a1_s]), _softmax(z[:, a1_s:])], axis=-1
    ).astype(out_ref.dtype)


def net_forward(x, fc1_w, fc2_w, fc3_w, *, block_b=256):
    """Pallas forward pass.

    x:     [B, state_size] float32 (B may be a stacked agent population)
    fc1_w: [hidden, state], fc2_w: [a1_s, hidden], fc3_w: [a2_s, hidden]
           (PyTorch nn.Linear [out, in] convention).
    Returns (x1 [B, a1_s], x2 [B, a2_s]).
    """
    B, S = x.shape
    H = fc1_w.shape[0]
    a1_s = fc2_w.shape[0]
    a2_s = fc3_w.shape[0]
    A = a1_s + a2_s

    # One-time host-side layout changes (no in-kernel transposes).
    w1t = jnp.asarray(fc1_w).T                                     # [S, H]
    w23t = jnp.concatenate([fc2_w, fc3_w], axis=0).T               # [H, A]

    # Batch tiling: tiny B -> single tile; population-scale B -> 128/256-row
    # tiles over a parallel grid axis (shards across TCs on v7x, fills MXU M).
    if B >= block_b and B % block_b == 0:
        tb = block_b
    elif B >= 128 and B % 128 == 0:
        tb = 128
    else:
        tb = B
    grid = (B // tb,)

    out = pl.pallas_call(
        functools.partial(_net_kernel, a1_s=a1_s),
        out_shape=jax.ShapeDtypeStruct((B, A), jnp.float32),
        grid_spec=pltpu.PrefetchScalarGridSpec(
            num_scalar_prefetch=0,
            grid=grid,
            in_specs=[
                pl.BlockSpec((tb, S), lambda i: (i, 0)),
                pl.BlockSpec((S, H), lambda i: (0, 0)),   # weights resident
                pl.BlockSpec((H, A), lambda i: (0, 0)),   # across the grid
            ],
            out_specs=pl.BlockSpec((tb, A), lambda i: (i, 0)),
        ),
        compiler_params=pltpu.CompilerParams(
            dimension_semantics=("parallel",)),
    )(x, w1t, w23t)
    # Split the combined lane-dense output back into the two heads.
    return out[:, :a1_s], out[:, a1_s:]


def net_forward_ref(x, fc1_w, fc2_w, fc3_w):
    """Pure-JAX reference matching the PyTorch semantics."""
    h = jax.nn.relu(x @ fc1_w.T)
    x1 = jax.nn.softmax(jax.nn.relu(h @ fc2_w.T), axis=-1)
    x2 = jax.nn.softmax(jax.nn.relu(h @ fc3_w.T), axis=-1)
    return x1, x2


if __name__ == "__main__":
    # Small shapes consistent with the module's __init__.
    batch = 2
    state_size = 16
    hidden_size = 32
    a1_s = 8
    a2_s = 8

    key = jax.random.PRNGKey(0)
    kx, k1, k2, k3, kp = jax.random.split(key, 5)

    x = jax.random.normal(kx, (batch, state_size), dtype=jnp.float32)
    # Deterministic synthetic weights (PyTorch nn.Linear layout: [out, in]).
    fc1_w = jax.random.normal(k1, (hidden_size, state_size), dtype=jnp.float32) * 0.1
    fc2_w = jax.random.normal(k2, (a1_s, hidden_size), dtype=jnp.float32) * 0.1
    fc3_w = jax.random.normal(k3, (a2_s, hidden_size), dtype=jnp.float32) * 0.1

    # --- tiny-batch path (single grid point) ---
    x1, x2 = net_forward(x, fc1_w, fc2_w, fc3_w)
    jax.block_until_ready((x1, x2))
    r1, r2 = net_forward_ref(x, fc1_w, fc2_w, fc3_w)
    # approx reciprocal on the EUP -> relax tolerance from 1e-5 to ~1e-3.
    assert jnp.allclose(x1, r1, atol=3e-3), "head 1 mismatch (small batch)"
    assert jnp.allclose(x2, r2, atol=3e-3), "head 2 mismatch (small batch)"

    # --- population-scale path (grid tiled over batch rows, parallel axis) ---
    pop = 256  # e.g. a whole evolution population stacked into one call
    xp = jax.random.normal(kp, (pop, state_size), dtype=jnp.float32)
    p1, p2 = net_forward(xp, fc1_w, fc2_w, fc3_w)
    jax.block_until_ready((p1, p2))
    q1, q2 = net_forward_ref(xp, fc1_w, fc2_w, fc3_w)
    assert jnp.allclose(p1, q1, atol=3e-3), "head 1 mismatch (population batch)"
    assert jnp.allclose(p2, q2, atol=3e-3), "head 2 mismatch (population batch)"

    # TODO(synk): for per-timestep inference loops, keep weights resident across
    # many pallas_calls (cross-call VMEM futures) instead of re-sending each call.
    print("KERNEL_OK")
</pallas_src>

<mosaic_0001>
module attributes {stable_mosaic.version = 11 : i64} {
  func.func @_net_kernel(%arg0: i32, %arg1: memref<2x16xf32, #tpu.memory_space<vmem>>, %arg2: memref<16x32xf32, #tpu.memory_space<vmem>>, %arg3: memref<32x16xf32, #tpu.memory_space<vmem>>, %arg4: memref<2x16xf32, #tpu.memory_space<vmem>>) attributes {dimension_semantics = [#tpu.dimension_semantics<parallel>], iteration_bounds = array<i64: 1>, scalar_prefetch = 0 : i64, scratch_operands = 0 : i64, tpu.core_type = #tpu.core_type<tc>, window_params = [{transform_indices = @transform_0, window_bounds = array<i64: 2, 16>}, {pipeline_mode = #tpu.pipeline_mode<synchronous>, transform_indices = @transform_1, window_bounds = array<i64: 16, 32>}, {pipeline_mode = #tpu.pipeline_mode<synchronous>, transform_indices = @transform_2, window_bounds = array<i64: 32, 16>}, {transform_indices = @transform_3, window_bounds = array<i64: 2, 16>}]} {
    %c0 = arith.constant 0 : index
    %c0_0 = arith.constant 0 : index
    %0 = vector.load %arg1[%c0, %c0_0] : memref<2x16xf32, #tpu.memory_space<vmem>>, vector<2x16xf32>
    %c0_1 = arith.constant 0 : index
    %c0_2 = arith.constant 0 : index
    %1 = vector.load %arg2[%c0_1, %c0_2] : memref<16x32xf32, #tpu.memory_space<vmem>>, vector<16x32xf32>
    %cst = arith.constant dense<0.000000e+00> : vector<2x32xf32>
    %2 = tpu.matmul %0, %1, %cst {dimension_numbers = #tpu.dot_dimension_numbers<[1], [0], [0], [1], [0, 0, 1, 1], [], []>} : vector<2x16xf32>, vector<16x32xf32>, vector<2x32xf32> -> vector<2x32xf32>
    %cst_3 = arith.constant 0.000000e+00 : f32
    %3 = vector.broadcast %cst_3 : f32 to vector<2x32xf32>
    %4 = arith.maximumf %2, %3 : vector<2x32xf32>
    %c0_4 = arith.constant 0 : index
    %c0_5 = arith.constant 0 : index
    %5 = vector.load %arg3[%c0_4, %c0_5] : memref<32x16xf32, #tpu.memory_space<vmem>>, vector<32x16xf32>
    %cst_6 = arith.constant dense<0.000000e+00> : vector<2x16xf32>
    %6 = tpu.matmul %4, %5, %cst_6 {dimension_numbers = #tpu.dot_dimension_numbers<[1], [0], [0], [1], [0, 0, 1, 1], [], []>} : vector<2x32xf32>, vector<32x16xf32>, vector<2x16xf32> -> vector<2x16xf32>
    %cst_7 = arith.constant 0.000000e+00 : f32
    %7 = vector.broadcast %cst_7 : f32 to vector<2x16xf32>
    %8 = arith.maximumf %6, %7 : vector<2x16xf32>
    %9 = vector.extract_strided_slice %8 {offsets = [0, 0], sizes = [2, 8], strides = [1, 1]} : vector<2x16xf32> to vector<2x8xf32>
    %cst_8 = arith.constant dense<0xFF800000> : vector<2xf32>
    %10 = vector.multi_reduction <maximumf>, %9, %cst_8 [1] : vector<2x8xf32> to vector<2xf32>
    %11 = vector.shape_cast %10 : vector<2xf32> to vector<2x1xf32>
    %12 = vector.broadcast %11 : vector<2x1xf32> to vector<2x8xf32>
    %13 = arith.subf %9, %12 : vector<2x8xf32>
    %14 = math.exp %13 : vector<2x8xf32>
    %cst_9 = arith.constant dense<0.000000e+00> : vector<2xf32>
    %15 = vector.multi_reduction <add>, %14, %cst_9 [1] : vector<2x8xf32> to vector<2xf32>
    %16 = vector.shape_cast %15 : vector<2xf32> to vector<2x1xf32>
    %17 = tpu.reciprocal %16 {approx = true} : vector<2x1xf32> -> vector<2x1xf32>
    %18 = vector.broadcast %17 : vector<2x1xf32> to vector<2x8xf32>
    %19 = arith.mulf %14, %18 : vector<2x8xf32>
    %20 = vector.extract_strided_slice %8 {offsets = [0, 8], sizes = [2, 8], strides = [1, 1]} : vector<2x16xf32> to vector<2x8xf32>
    %cst_10 = arith.constant dense<0xFF800000> : vector<2xf32>
    %21 = vector.multi_reduction <maximumf>, %20, %cst_10 [1] : vector<2x8xf32> to vector<2xf32>
    %22 = vector.shape_cast %21 : vector<2xf32> to vector<2x1xf32>
    %23 = vector.broadcast %22 : vector<2x1xf32> to vector<2x8xf32>
    %24 = arith.subf %20, %23 : vector<2x8xf32>
    %25 = math.exp %24 : vector<2x8xf32>
    %cst_11 = arith.constant dense<0.000000e+00> : vector<2xf32>
    %26 = vector.multi_reduction <add>, %25, %cst_11 [1] : vector<2x8xf32> to vector<2xf32>
    %27 = vector.shape_cast %26 : vector<2xf32> to vector<2x1xf32>
    %28 = tpu.reciprocal %27 {approx = true} : vector<2x1xf32> -> vector<2x1xf32>
    %29 = vector.broadcast %28 : vector<2x1xf32> to vector<2x8xf32>
    %30 = arith.mulf %25, %29 : vector<2x8xf32>
    %31 = tpu.concatenate %19, %30 in 1 : vector<2x8xf32>, vector<2x8xf32> -> vector<2x16xf32>
    %c0_12 = arith.constant 0 : index
    %c0_13 = arith.constant 0 : index
    %32 = vector.load %arg4[%c0_12, %c0_13] : memref<2x16xf32, #tpu.memory_space<vmem>>, vector<2x16xf32>
    tpu.vector_store %arg4[%c0_12, %c0_13], %31 {strides = array<i32>} : memref<2x16xf32, #tpu.memory_space<vmem>>, vector<2x16xf32>,
    return
  }
  func.func @transform_0(%arg0: i32) -> (i32, i32) {
    %c0_i32 = arith.constant 0 : i32
    %c0_i32_0 = arith.constant 0 : i32
    return %arg0, %c0_i32 : i32, i32
  }
  func.func @transform_1(%arg0: i32) -> (i32, i32) {
    %c0_i32 = arith.constant 0 : i32
    %c0_i32_0 = arith.constant 0 : i32
    %c0_i32_1 = arith.constant 0 : i32
    return %c0_i32, %c0_i32_0 : i32, i32
  }
  func.func @transform_2(%arg0: i32) -> (i32, i32) {
    %c0_i32 = arith.constant 0 : i32
    %c0_i32_0 = arith.constant 0 : i32
    %c0_i32_1 = arith.constant 0 : i32
    return %c0_i32, %c0_i32_0 : i32, i32
  }
  func.func @transform_3(%arg0: i32) -> (i32, i32) {
    %c0_i32 = arith.constant 0 : i32
    %c0_i32_0 = arith.constant 0 : i32
    return %arg0, %c0_i32 : i32, i32
  }
}

</mosaic_0001>

<bundles_post_ra>
// kernel: tpu_custom_call.1
= control target key start
LH: loop header
LB: loop body
LE: loop exit
PB: predicated region body
PF: predicated region fallthrough
CT: control target
= control target key end

     0   :  { %v292_v2 = vmov 0.0|0.0   ;;  %vm293_vm0 = vmmov 0   ;;  %v294_v4 = vmov 0.0   ;;  %s353_s0 = inlined_call_operand.vmem [shape: f32[2,16], index: 0, kind: input, shape index: {}]   ;;  %s354_s1 = inlined_call_operand.vmem [shape: f32[16,32], index: 1, kind: input, shape index: {}]   ;;  %s355_s2 = inlined_call_operand.vmem [shape: f32[32,16], index: 2, kind: input, shape index: {}]   ;;  %s356_s3 = inlined_call_operand.hbm [shape: f32[2,16], index: 3, kind: output, shape index: {}]  }
   0x1   :  { %v16_v0 = vld [vmem:[%s354_s1] sm:$0xff]  ;;  %v17_v1 = vld [vmem:[%s354_s1 + $0x8] sm:$0xff]  ;;  %246 = vmatprep.subr.bf16.mxu0 %v292_v2  ;;  %232 = vmatprep.mubr.msk.f32.mxu0 %vm293_vm0, %v294_v4 }
   0x2   :  { %v247_v3 = vpack.c.bf16 %v17_v1, %v16_v0  ;;  %v93_v5 = vld [vmem:[%s355_s2] sm:$0xff]  ;;  %v94_v6 = vld [vmem:[%s355_s2 + $0x8] sm:$0xff]  ;;  %249 = vmatprep.subr.bf16.mxu1 %v292_v2  ;;  %243 = vmatprep.mubr.msk.f32.mxu1 %vm293_vm0, %v294_v4 }
   0x3   :  { %v250_v7 = vpack.c.bf16 %v94_v6, %v93_v5 }
   0x4   :  { %8 = vsyncpa [#allocation3], 0  ;;  %248 = vmatpush3.bf16.msra.mxu0 %v247_v3  ;;  %v15_v8 = vld [vmem:[%s353_s0] sm:$0x3]  ;;  %vm18_vm1 = vcmask 130048   ;;  %v95_v9 = vld [vmem:[%s355_s2 + $0x10] sm:$0xff] }
   0x5   :  { %251 = vmatpush3.bf16.msra.mxu1 %v250_v7  ;;  %v96_v10 = vld [vmem:[%s355_s2 + $0x18] sm:$0xff]  ;;  %vm97_vm2 = vcmask 261120   ;;  %vm184_vm3 = vcmask 123968   ;;  %vm172_vm4 = vcmask 58368   ;;  %s295_s0 = smov 120   ;;  %s296_s2 = smov [#allocation2]  }
   0x6   :  { %252 = vmatprep.subr.bf16.mxu1 %v292_v2  ;;  %v253_v11 = vpack.c.bf16 %v96_v10, %v95_v9  ;;  %s210_s25 = sshll.u32 %s296_s2, 4  ;;  %vm200_vm5 = vcmask 64512   ;;  %vm202_vm6 = vcmask 123904   ;;  %s211_s25 = int_to_ptr.vmem [resolvable:$true] %s210_s25 }
   0x7   :  { %233 = vmatmul.mubr.msk.f32.vlgmr.msra.gmra.mrb[0].mxu0 %vm18_vm1, %v15_v8  ;;  %s268_s26 = scalar_lea.vmem %s211_s25, 32  ;;  %p273_p1 = scmp.lt.s32.totalorder %s211_s25, %s211_s25 }
   0x8   :  { %p269_p0 = scmp.ne.s32.totalorder %s211_s25, %s268_s26  ;;  %p274_p2 = scmp.lt.s32.totalorder %s268_s26, %s268_s26 }
   0x9   :  { %254 = vmatpush3.bf16.msra.mxu1 %v253_v11 }
   0xa   :  { %p275_p3 = por %p274_p2, %p273_p1 }
   0xc   :  { %p276_p4 = pnand %p275_p3, %p269_p0 }
  0xda   :  { %v88_v12 = vpop.f32.mrb[0].mxu0 }
  0xdb   :  { %v92_v13 = vmax.f32 %v88_v12, 0.0  ;;  %v234_v14 = vpop.f32.mrb[1].mxu0 }
  0xdd   :  { %244 = vmatmul.mubr.msk.f32.vlgmr.msra.gmra.mrb[0].mxu1 %vm97_vm2, %v92_v13 }
 0x1b0   :  { %v167_v15 = vpop.f32.mrb[0].mxu1 }
 0x1b1   :  { %v171_v16 = vmax.f32 %v167_v15, 0.0  ;;  %v245_v17 = vpop.f32.mrb[1].mxu1 }
 0x1b3   :  { %v185_v18 = vsel %vm184_vm3, %v171_v16, -inf  ;;  %v173_v19 = vsel %vm172_vm4, %v171_v16, -inf }
 0x1b4   :  { %186 = vmax.xlane.f32.xlu0 %v185_v18 }
 0x1b8   :  { %174 = vmax.xlane.f32.xlu0 %v173_v19 }
 0x241   :  { %v187_v20 = vpop.xlane.xlu0 %186 }
 0x242   :  { %v188_v21 = vsub.f32 %v171_v16, %v187_v20 }
 0x244   :  { %v189_v22 = vmul.f32 1.442695, %v188_v21 }
 0x245   :  { %v175_v24 = vpop.xlane.xlu0 %174 }
 0x246   :  { %260 = vpow2.f32 %v189_v22  ;;  %v176_v25 = vsub.f32 %v171_v16, %v175_v24 }
 0x248   :  { %v177_v26 = vmul.f32 1.442695, %v176_v25 }
 0x24a   :  { %262 = vpow2.f32 %v177_v26 }
 0x250   :  { %v261_v23 = vpop.eup %260 }
 0x251   :  { %192 = vrot.lane.b32.xlu1 %v261_v23, %s295_s0 }
 0x254   :  { %v263_v27 = vpop.eup %262 }
 0x255   :  { %v179_v28 = vsel %vm172_vm4, %v263_v27, 0.0 }
 0x275   :  { %180 = vadd.xlane.f32.xlu1 %v179_v28 }
 0x2c3   :  { %v193_v29 = vpop.permute.xlu1 %192 }
 0x2c4   :  { %v195_v30 = vsel %vm172_vm4, %v193_v29, 0.0 }
 0x2c5   :  { %196 = vadd.xlane.f32.xlu0 %v195_v30 }
 0x302   :  { %v181_v31 = vpop.xlane.xlu1 %180 }
 0x303   :  { %264 = vrcp.f32 %v181_v31 }
 0x30d   :  { %v265_v33 = vpop.eup %264 }
 0x30e   :  { %v183_v35 = vmul.f32 %v265_v33, %v263_v27 }
 0x352   :  { %v197_v32 = vpop.xlane.xlu0 %196 }
 0x353   :  { %266 = vrcp.f32 %v197_v32 }
 0x35d   :  { %v267_v34 = vpop.eup %266 }
 0x35e   :  { %v199_v36 = vmul.f32 %v267_v34, %v261_v23 }
 0x360   :  { %v201_v37 = vsel %vm200_vm5, %v183_v35, %v199_v36 }
 0x361   :  { %203 = vst.msk [vmem:[#allocation2] sm:$0x3] %vm202_vm6, %v201_v37 }
 0x362   :  { %279 = shalt.err (!%p276_p4)
}
 0x363   :  { %s280_s29 = scalar_lea.hbm %s356_s3, 32 }
 0x364   :  { %p281_p5 = scmp.ne.s32.totalorder %s356_s3, %s280_s29  ;;  %p284_p6 = scmp.lt.u32.totalorder %s280_s29, %s356_s3 }
 0x366   :  { %p286_p7 = pnand %p284_p6, %p281_p5 }
 0x368   :  { %289 = shalt.err (!%p286_p7)
}
 0x369   :  { %213 = dma.vmem_to_hbm [thread:$0]  %s211_s25, 32, %s356_s3, [#allocation3]  }
 0x36a   :  { %290 = dma.done.wait [#allocation3], 32  }
 0x36b   :  { %291 = vsyncadd [#allocation3], 4294967264 }
 0x36c   :  { %217 = vsyncpa [#allocation3], 1 }

</bundles_post_ra>
